<compile_context>
chip_gen: v7x
topology: tpu7x:2x2x1
jax: 0.10.0
libtpu: 0.0.40
codegen_flags: <defaults>
</compile_context>

<pallas_src>
import jax
import jax.numpy as jnp
from jax.experimental import pallas as pl
from jax.experimental.pallas import tpu as pltpu

LANE = 128       # TPU lane width (hidden dim padded to this)
TM_MAX = 2048    # max batch tile; per-tile buffers stay tiny even at this size


def _cdiv(a, b):
    return -(-a // b)


def _round_up(n, m):
    return ((n + m - 1) // m) * m


def _pad2d(a, rows, cols):
    r, c = a.shape
    if r == rows and c == cols:
        return a
    return jnp.pad(a, ((0, rows - r), (0, cols - c)))


def dqn_kernel(x_ref, w1_ref, b1_ref, w2_ref, b2_ref, w3_ref, b3_ref, o_ref):
    wdt = w1_ref.dtype  # f32 by default; bf16 if opted in (casts are no-ops for f32)

    # Layer 1: x @ W1 + b1, ReLU   (MXU matmul with f32 accumulation, VPU bias+relu)
    h1 = jnp.dot(x_ref[...].astype(wdt), w1_ref[...],
                 preferred_element_type=jnp.float32)
    h1 = jnp.maximum(h1 + b1_ref[...], 0.0)

    # Layer 2: h1 @ W2 + b2, ReLU
    h2 = jnp.dot(h1.astype(wdt), w2_ref[...], preferred_element_type=jnp.float32)
    h2 = jnp.maximum(h2 + b2_ref[...], 0.0)

    # Layer 3: h2 @ W3 + b3 (no activation); output block is (tm, num_actions)
    out = jnp.dot(h2.astype(wdt), w3_ref[...], preferred_element_type=jnp.float32)
    o_ref[...] = (out + b3_ref[...]).astype(o_ref.dtype)


def pad_params(params, weight_dtype=jnp.float32):
    """One-time (outside the hot path) zero-padding of hidden dim 64 -> 128.

    Zero pad rows/cols are mathematically inert (0*w + 0 bias -> 0 through ReLU).
    Optionally stores weights in bf16 (opt-in; breaks the 1e-5 fp32 match)."""
    w1, b1 = params["w1"], params["b1"]
    w2, b2 = params["w2"], params["b2"]
    w3, b3 = params["w3"], params["b3"]
    num_inputs, hidden = w1.shape
    num_actions = w3.shape[1]
    hidden_pad = _round_up(hidden, LANE)

    padded = {
        "w1": _pad2d(w1, num_inputs, hidden_pad).astype(weight_dtype),
        "b1": _pad2d(b1, 1, hidden_pad),                        # biases stay f32
        "w2": _pad2d(w2, hidden_pad, hidden_pad).astype(weight_dtype),
        "b2": _pad2d(b2, 1, hidden_pad),
        "w3": _pad2d(w3, hidden_pad, num_actions).astype(weight_dtype),
        "b3": b3.astype(jnp.float32),
        "num_inputs": num_inputs,
        "hidden_pad": hidden_pad,
        "num_actions": num_actions,
    }
    return padded


def _select_tile(B, tm_max=TM_MAX):
    """Even-split batch tiling: minimal padding, full grid steps.
    Forces >= 2 steps when B > 256 so the v7x second TensorCore gets work."""
    n_steps = _cdiv(B, tm_max)
    if B > 256:
        n_steps = max(n_steps, 2)
    tm = _round_up(_cdiv(B, n_steps), 8)
    b_pad = _round_up(B, tm)
    return tm, b_pad


def dqn_forward(x, padded):
    """x: (B, num_inputs) float32; padded: output of pad_params()."""
    B, num_inputs = x.shape
    assert num_inputs == padded["num_inputs"]
    hidden_pad = padded["hidden_pad"]
    num_actions = padded["num_actions"]

    tm, b_pad = _select_tile(B)
    x_p = x if b_pad == B else jnp.pad(x, ((0, b_pad - B), (0, 0)))

    grid = (b_pad // tm,)

    out_padded = pl.pallas_call(
        dqn_kernel,
        out_shape=jax.ShapeDtypeStruct((b_pad, num_actions), jnp.float32),
        grid=grid,
        in_specs=[
            # x: streamed per batch tile (last dim == full array dim -> legal)
            pl.BlockSpec((tm, num_inputs), lambda i: (i, 0)),
            # weights/biases: constant index_map -> DMA'd once, VMEM-resident
            pl.BlockSpec((num_inputs, hidden_pad), lambda i: (0, 0)),
            pl.BlockSpec((1, hidden_pad), lambda i: (0, 0)),
            pl.BlockSpec((hidden_pad, hidden_pad), lambda i: (0, 0)),
            pl.BlockSpec((1, hidden_pad), lambda i: (0, 0)),
            pl.BlockSpec((hidden_pad, num_actions), lambda i: (0, 0)),
            pl.BlockSpec((1, num_actions), lambda i: (0, 0)),
        ],
        # Output block last dim equals the full array dim (num_actions): no lane
        # padding, no write amplification, no wrapper re-slice of the lanes.
        out_specs=pl.BlockSpec((tm, num_actions), lambda i: (i, 0)),
        compiler_params=pltpu.CompilerParams(
            dimension_semantics=("parallel",),
        ),
    )(x_p, padded["w1"], padded["b1"], padded["w2"], padded["b2"],
      padded["w3"], padded["b3"])

    return out_padded if b_pad == B else out_padded[:B]


def init_params(key, num_inputs, num_actions, hidden=64):
    """Deterministic init mimicking nn.Linear's uniform(-1/sqrt(fan_in), 1/sqrt(fan_in)).
    Weights stored as (in_features, out_features) so the kernel does x @ W + b,
    which equals PyTorch's x @ W_pt.T + b_pt."""
    ks = jax.random.split(key, 6)

    def lin(kw, kb, fan_in, fan_out):
        bound = 1.0 / jnp.sqrt(jnp.float32(fan_in))
        w = jax.random.uniform(kw, (fan_in, fan_out), jnp.float32, -bound, bound)
        b = jax.random.uniform(kb, (1, fan_out), jnp.float32, -bound, bound)
        return w, b

    w1, b1 = lin(ks[0], ks[1], num_inputs, hidden)
    w2, b2 = lin(ks[2], ks[3], hidden, hidden)
    w3, b3 = lin(ks[4], ks[5], hidden, num_actions)
    return {"w1": w1, "b1": b1, "w2": w2, "b2": b2, "w3": w3, "b3": b3}


def dqn_reference(x, params):
    h1 = jnp.maximum(x @ params["w1"] + params["b1"], 0.0)
    h2 = jnp.maximum(h1 @ params["w2"] + params["b2"], 0.0)
    return h2 @ params["w3"] + params["b3"]


if __name__ == "__main__":
    key = jax.random.PRNGKey(0)
    k_param, k_x = jax.random.split(key)

    batch, num_inputs, num_actions = 4, 8, 4
    params = init_params(k_param, num_inputs, num_actions)
    padded = pad_params(params)                  # one-time, outside the hot path
    padded = jax.tree_util.tree_map(
        lambda a: jax.block_until_ready(a) if isinstance(a, jax.Array) else a, padded)

    x = jax.random.normal(k_x, (batch, num_inputs), jnp.float32)

    out = dqn_forward(x, padded)
    out = jax.block_until_ready(out)

    ref = dqn_reference(x, params)
    assert out.shape == (batch, num_actions)
    assert jnp.allclose(out, ref, atol=1e-5, rtol=1e-5), "mismatch vs reference"

    # Larger batch exercises the multi-step (>=2 on v7x) grid path with even tiling.
    big_B = 600
    xb = jax.random.normal(jax.random.PRNGKey(1), (big_B, num_inputs), jnp.float32)
    outb = jax.block_until_ready(dqn_forward(xb, padded))
    refb = dqn_reference(xb, params)
    assert outb.shape == (big_B, num_actions)
    assert jnp.allclose(outb, refb, atol=1e-5, rtol=1e-5), "mismatch vs reference (tiled)"

    # Optional bf16 matmul path (opt-in; intentionally looser tolerance).
    padded_bf16 = pad_params(params, weight_dtype=jnp.bfloat16)
    out_bf16 = jax.block_until_ready(dqn_forward(xb, padded_bf16))
    assert jnp.allclose(out_bf16, refb, atol=3e-2, rtol=3e-2), "bf16 path diverged"

    print("KERNEL_OK")
</pallas_src>

<mosaic_0001>
module attributes {stable_mosaic.version = 11 : i64} {
  func.func @dqn_kernel(%arg0: i32, %arg1: memref<8x8xf32, #tpu.memory_space<vmem>>, %arg2: memref<8x128xf32, #tpu.memory_space<vmem>>, %arg3: memref<1x128xf32, #tpu.memory_space<vmem>>, %arg4: memref<128x128xf32, #tpu.memory_space<vmem>>, %arg5: memref<1x128xf32, #tpu.memory_space<vmem>>, %arg6: memref<128x4xf32, #tpu.memory_space<vmem>>, %arg7: memref<1x4xf32, #tpu.memory_space<vmem>>, %arg8: memref<8x4xf32, #tpu.memory_space<vmem>>) attributes {dimension_semantics = [#tpu.dimension_semantics<parallel>], iteration_bounds = array<i64: 1>, scalar_prefetch = 0 : i64, scratch_operands = 0 : i64, tpu.core_type = #tpu.core_type<tc>, window_params = [{transform_indices = @transform_0, window_bounds = array<i64: 8, 8>}, {pipeline_mode = #tpu.pipeline_mode<synchronous>, transform_indices = @transform_1, window_bounds = array<i64: 8, 128>}, {pipeline_mode = #tpu.pipeline_mode<synchronous>, transform_indices = @transform_2, window_bounds = array<i64: 1, 128>}, {pipeline_mode = #tpu.pipeline_mode<synchronous>, transform_indices = @transform_3, window_bounds = array<i64: 128, 128>}, {pipeline_mode = #tpu.pipeline_mode<synchronous>, transform_indices = @transform_4, window_bounds = array<i64: 1, 128>}, {pipeline_mode = #tpu.pipeline_mode<synchronous>, transform_indices = @transform_5, window_bounds = array<i64: 128, 4>}, {pipeline_mode = #tpu.pipeline_mode<synchronous>, transform_indices = @transform_6, window_bounds = array<i64: 1, 4>}, {transform_indices = @transform_7, window_bounds = array<i64: 8, 4>}]} {
    %c0 = arith.constant 0 : index
    %c0_0 = arith.constant 0 : index
    %0 = vector.load %arg1[%c0, %c0_0] : memref<8x8xf32, #tpu.memory_space<vmem>>, vector<8x8xf32>
    %c0_1 = arith.constant 0 : index
    %c0_2 = arith.constant 0 : index
    %1 = vector.load %arg2[%c0_1, %c0_2] : memref<8x128xf32, #tpu.memory_space<vmem>>, vector<8x128xf32>
    %cst = arith.constant dense<0.000000e+00> : vector<8x128xf32>
    %2 = tpu.matmul %0, %1, %cst {dimension_numbers = #tpu.dot_dimension_numbers<[1], [0], [0], [1], [0, 0, 1, 1], [], []>} : vector<8x8xf32>, vector<8x128xf32>, vector<8x128xf32> -> vector<8x128xf32>
    %c0_3 = arith.constant 0 : index
    %c0_4 = arith.constant 0 : index
    %3 = vector.load %arg3[%c0_3, %c0_4] : memref<1x128xf32, #tpu.memory_space<vmem>>, vector<1x128xf32>
    %4 = vector.broadcast %3 : vector<1x128xf32> to vector<8x128xf32>
    %5 = arith.addf %2, %4 : vector<8x128xf32>
    %cst_5 = arith.constant 0.000000e+00 : f32
    %6 = vector.broadcast %cst_5 : f32 to vector<8x128xf32>
    %7 = arith.maximumf %5, %6 : vector<8x128xf32>
    %c0_6 = arith.constant 0 : index
    %c0_7 = arith.constant 0 : index
    %8 = vector.load %arg4[%c0_6, %c0_7] : memref<128x128xf32, #tpu.memory_space<vmem>>, vector<128x128xf32>
    %cst_8 = arith.constant dense<0.000000e+00> : vector<8x128xf32>
    %9 = tpu.matmul %7, %8, %cst_8 {dimension_numbers = #tpu.dot_dimension_numbers<[1], [0], [0], [1], [0, 0, 1, 1], [], []>} : vector<8x128xf32>, vector<128x128xf32>, vector<8x128xf32> -> vector<8x128xf32>
    %c0_9 = arith.constant 0 : index
    %c0_10 = arith.constant 0 : index
    %10 = vector.load %arg5[%c0_9, %c0_10] : memref<1x128xf32, #tpu.memory_space<vmem>>, vector<1x128xf32>
    %11 = vector.broadcast %10 : vector<1x128xf32> to vector<8x128xf32>
    %12 = arith.addf %9, %11 : vector<8x128xf32>
    %cst_11 = arith.constant 0.000000e+00 : f32
    %13 = vector.broadcast %cst_11 : f32 to vector<8x128xf32>
    %14 = arith.maximumf %12, %13 : vector<8x128xf32>
    %c0_12 = arith.constant 0 : index
    %c0_13 = arith.constant 0 : index
    %15 = vector.load %arg6[%c0_12, %c0_13] : memref<128x4xf32, #tpu.memory_space<vmem>>, vector<128x4xf32>
    %cst_14 = arith.constant dense<0.000000e+00> : vector<8x4xf32>
    %16 = tpu.matmul %14, %15, %cst_14 {dimension_numbers = #tpu.dot_dimension_numbers<[1], [0], [0], [1], [0, 0, 1, 1], [], []>} : vector<8x128xf32>, vector<128x4xf32>, vector<8x4xf32> -> vector<8x4xf32>
    %c0_15 = arith.constant 0 : index
    %c0_16 = arith.constant 0 : index
    %17 = vector.load %arg7[%c0_15, %c0_16] : memref<1x4xf32, #tpu.memory_space<vmem>>, vector<1x4xf32>
    %18 = vector.broadcast %17 : vector<1x4xf32> to vector<8x4xf32>
    %19 = arith.addf %16, %18 : vector<8x4xf32>
    %c0_17 = arith.constant 0 : index
    %c0_18 = arith.constant 0 : index
    %20 = vector.load %arg8[%c0_17, %c0_18] : memref<8x4xf32, #tpu.memory_space<vmem>>, vector<8x4xf32>
    tpu.vector_store %arg8[%c0_17, %c0_18], %19 {strides = array<i32>} : memref<8x4xf32, #tpu.memory_space<vmem>>, vector<8x4xf32>,
    return
  }
  func.func @transform_0(%arg0: i32) -> (i32, i32) {
    %c0_i32 = arith.constant 0 : i32
    %c0_i32_0 = arith.constant 0 : i32
    return %arg0, %c0_i32 : i32, i32
  }
  func.func @transform_1(%arg0: i32) -> (i32, i32) {
    %c0_i32 = arith.constant 0 : i32
    %c0_i32_0 = arith.constant 0 : i32
    %c0_i32_1 = arith.constant 0 : i32
    return %c0_i32, %c0_i32_0 : i32, i32
  }
  func.func @transform_2(%arg0: i32) -> (i32, i32) {
    %c0_i32 = arith.constant 0 : i32
    %c0_i32_0 = arith.constant 0 : i32
    %c0_i32_1 = arith.constant 0 : i32
    return %c0_i32, %c0_i32_0 : i32, i32
  }
  func.func @transform_3(%arg0: i32) -> (i32, i32) {
    %c0_i32 = arith.constant 0 : i32
    %c0_i32_0 = arith.constant 0 : i32
    %c0_i32_1 = arith.constant 0 : i32
    return %c0_i32, %c0_i32_0 : i32, i32
  }
  func.func @transform_4(%arg0: i32) -> (i32, i32) {
    %c0_i32 = arith.constant 0 : i32
    %c0_i32_0 = arith.constant 0 : i32
    %c0_i32_1 = arith.constant 0 : i32
    return %c0_i32, %c0_i32_0 : i32, i32
  }
  func.func @transform_5(%arg0: i32) -> (i32, i32) {
    %c0_i32 = arith.constant 0 : i32
    %c0_i32_0 = arith.constant 0 : i32
    %c0_i32_1 = arith.constant 0 : i32
    return %c0_i32, %c0_i32_0 : i32, i32
  }
  func.func @transform_6(%arg0: i32) -> (i32, i32) {
    %c0_i32 = arith.constant 0 : i32
    %c0_i32_0 = arith.constant 0 : i32
    %c0_i32_1 = arith.constant 0 : i32
    return %c0_i32, %c0_i32_0 : i32, i32
  }
  func.func @transform_7(%arg0: i32) -> (i32, i32) {
    %c0_i32 = arith.constant 0 : i32
    %c0_i32_0 = arith.constant 0 : i32
    return %arg0, %c0_i32 : i32, i32
  }
}

</mosaic_0001>

<bundles_post_ra>
// kernel: tpu_custom_call.1
= control target key start
LH: loop header
LB: loop body
LE: loop exit
PB: predicated region body
PF: predicated region fallthrough
CT: control target
= control target key end

     0   :  { %12 = vsyncpa [#allocation3], 0  ;;  %s507_s24 = smov [#allocation2]   ;;  %s693_s0 = inlined_call_operand.vmem [shape: f32[8,8], index: 0, kind: input, shape index: {}]   ;;  %s694_s1 = inlined_call_operand.hbm [shape: f32[8,128], index: 1, kind: input, shape index: {}]   ;;  %s695_s2 = inlined_call_operand.vmem [shape: f32[1,128], index: 2, kind: input, shape index: {}]   ;;  %s696_s3 = inlined_call_operand.vmem [shape: f32[128,128], index: 3, kind: input, shape index: {}]   ;;  %s697_s4 = inlined_call_operand.vmem [shape: f32[1,128], index: 4, kind: input, shape index: {}]   ;;  %s698_s5 = inlined_call_operand.vmem [shape: f32[128,4], index: 5, kind: input, shape index: {}]   ;;  %s699_s6 = inlined_call_operand.vmem [shape: f32[1,4], index: 6, kind: input, shape index: {}]   ;;  %s700_s7 = inlined_call_operand.vmem [shape: f32[8,4], index: 7, kind: output, shape index: {}]  }
   0x1   :  { %s21_s25 = sshll.u32 %s507_s24, 4  ;;  %s483_s28 = scalar_lea.hbm %s694_s1, 128  ;;  %s22_s25 = int_to_ptr.vmem [resolvable:$true] %s21_s25 }
   0x2   :  { %p484_p0 = scmp.ne.s32.totalorder %s694_s1, %s483_s28  ;;  %p487_p1 = scmp.lt.u32.totalorder %s483_s28, %s694_s1 }
   0x4   :  { %p489_p2 = pnand %p487_p1, %p484_p0 }
   0x6   :  { %492 = shalt.err (!%p489_p2)
}
   0x7   :  { %s493_s10 = scalar_lea.vmem %s22_s25, 128  ;;  %p498_p4 = scmp.lt.s32.totalorder %s22_s25, %s22_s25 }
   0x8   :  { %p494_p3 = scmp.ne.s32.totalorder %s22_s25, %s493_s10  ;;  %p499_p5 = scmp.lt.s32.totalorder %s493_s10, %s493_s10 }
   0xa   :  { %p500_p6 = por %p499_p5, %p498_p4 }
   0xc   :  { %p501_p7 = pnand %p500_p6, %p494_p3 }
   0xe   :  { %504 = shalt.err (!%p501_p7)
}
   0xf   :  { %24 = dma.hbm_to_vmem [thread:$0]  %s694_s1, 128, %s22_s25, [#allocation3]  }
  0x10   :  { %505 = dma.done.wait [#allocation3], 128  }
  0x11   :  { %506 = vsyncadd [#allocation3], 4294967168  ;;  %v508_v0 = vmov 0.0   ;;  %vm509_vm0 = vmmov 0   ;;  %v510_v1 = vmov 0.0|0.0   ;;  %vm47_vm1 = vcmask 64512  }
  0x12   :  { %356 = vmatprep.subr.mxu0 %v508_v0  ;;  %358 = vmatprep.mubr.msk.f32.mxu0 %vm509_vm0, %v508_v0  ;;  %v39_v2 = vld [vmem:[#allocation2] sm:$0xff]  ;;  %v123_v5 = vld [vmem:[%s696_s3 + $0x8] sm:$0xff]  ;;  %v124_v6 = vld [vmem:[%s696_s3 + $0x10] sm:$0xff]  ;;  %vm309_vm2 = vcmask 31744  }
  0x13   :  { %431 = vmatprep.subr.bf16.mxu1 %v510_v1  ;;  %393 = vmatprep.mubr.msk.f32.mxu1 %vm509_vm0, %v508_v0  ;;  %v38_v3 = vld [vmem:[%s693_s0] sm:$0xff]  ;;  %v125_v7 = vld [vmem:[%s696_s3 + $0x18] sm:$0xff]  ;;  %v127_v11 = vld [vmem:[%s696_s3 + $0x28] sm:$0xff] }
  0x14   :  { %v122_v4 = vld [vmem:[%s696_s3] sm:$0xff]  ;;  %357 = vmatpush3.msra.mxu0 %v39_v2  ;;  %v435_v9 = vpack.c.bf16 %v125_v7, %v124_v6  ;;  %v128_v13 = vld [vmem:[%s696_s3 + $0x30] sm:$0xff]  ;;  %v129_v14 = vld [vmem:[%s696_s3 + $0x38] sm:$0xff] }
  0x15   :  { %359 = vmatmul.mubr.msk.f32.vlgmr.msra.gmra.mrb[0].mxu0 %vm47_vm1, %v38_v3  ;;  %v432_v8 = vpack.c.bf16 %v123_v5, %v122_v4  ;;  %455 = vmatprep.subr.bf16.mxu0 %v510_v1  ;;  %v126_v10 = vld [vmem:[%s696_s3 + $0x20] sm:$0xff]  ;;  %v441_v15 = vpack.c.bf16 %v129_v14, %v128_v13  ;;  %v131_v17 = vld [vmem:[%s696_s3 + $0x48] sm:$0xff]  ;;  %v132_v19 = vld [vmem:[%s696_s3 + $0x50] sm:$0xff] }
  0x16   :  { %428 = vmatprep.mubr.msk.f32.mxu0 %vm509_vm0, %v508_v0  ;;  %v438_v12 = vpack.c.bf16 %v127_v11, %v126_v10  ;;  %v130_v16 = vld [vmem:[%s696_s3 + $0x40] sm:$0xff]  ;;  %v133_v20 = vld [vmem:[%s696_s3 + $0x58] sm:$0xff]  ;;  %v135_v23 = vld [vmem:[%s696_s3 + $0x68] sm:$0xff] }
  0x17   :  { %433 = vmatpush3.bf16.msra.mxu1 %v432_v8  ;;  %v444_v18 = vpack.c.bf16 %v131_v17, %v130_v16  ;;  %v447_v21 = vpack.c.bf16 %v133_v20, %v132_v19  ;;  %v134_v22 = vld [vmem:[%s696_s3 + $0x60] sm:$0xff]  ;;  %v136_v25 = vld [vmem:[%s696_s3 + $0x70] sm:$0xff]  ;;  %v137_v26 = vld [vmem:[%s696_s3 + $0x78] sm:$0xff] }
  0x18   :  { %434 = vmatprep.subr.bf16.mxu1 %v510_v1  ;;  %v450_v24 = vpack.c.bf16 %v135_v23, %v134_v22  ;;  %v453_v27 = vpack.c.bf16 %v137_v26, %v136_v25  ;;  %v216_v28 = vld [vmem:[%s698_s5] sm:$0xff]  ;;  %v217_v29 = vld [vmem:[%s698_s5 + $0x8] sm:$0xff]  ;;  %v218_v30 = vld [vmem:[%s698_s5 + $0x10] sm:$0xff] }
  0x19   :  { %v456_v31 = vpack.c.bf16 %v217_v29, %v216_v28  ;;  %v219_v32 = vld [vmem:[%s698_s5 + $0x18] sm:$0xff]  ;;  %v220_v34 = vld [vmem:[%s698_s5 + $0x20] sm:$0xff]  ;;  %v221_v35 = vld [vmem:[%s698_s5 + $0x28] sm:$0xff] }
  0x1a   :  { %v459_v33 = vpack.c.bf16 %v219_v32, %v218_v30  ;;  %v462_v36 = vpack.c.bf16 %v221_v35, %v220_v34  ;;  %v222_v37 = vld [vmem:[%s698_s5 + $0x30] sm:$0xff]  ;;  %v223_v38 = vld [vmem:[%s698_s5 + $0x38] sm:$0xff]  ;;  %v224_v40 = vld [vmem:[%s698_s5 + $0x40] sm:$0xff] }
  0x1b   :  { %436 = vmatpush3.bf16.msra.mxu1 %v435_v9  ;;  %457 = vmatpush3.bf16.msra.mxu0 %v456_v31  ;;  %v465_v39 = vpack.c.bf16 %v223_v38, %v222_v37  ;;  %v225_v41 = vld [vmem:[%s698_s5 + $0x48] sm:$0xff]  ;;  %v226_v43 = vld [vmem:[%s698_s5 + $0x50] sm:$0xff]  ;;  %v227_v44 = vld [vmem:[%s698_s5 + $0x58] sm:$0xff] }
  0x1c   :  { %437 = vmatprep.subr.bf16.mxu1 %v510_v1  ;;  %458 = vmatprep.subr.bf16.mxu0 %v510_v1  ;;  %v468_v42 = vpack.c.bf16 %v225_v41, %v224_v40  ;;  %v471_v45 = vpack.c.bf16 %v227_v44, %v226_v43  ;;  %v228_v46 = vld [vmem:[%s698_s5 + $0x60] sm:$0xff]  ;;  %v229_v47 = vld [vmem:[%s698_s5 + $0x68] sm:$0xff]  ;;  %v230_v54 = vld [vmem:[%s698_s5 + $0x70] sm:$0xff] }
  0x1d   :  { %v474_v48 = vpack.c.bf16 %v229_v47, %v228_v46  ;;  %v316_v49 = vld [vmem:[%s695_s2] ss:$0 sm:$0xff]  ;;  %v231_v55 = vld [vmem:[%s698_s5 + $0x78] sm:$0xff] }
  0x1e   :  { %v477_v56 = vpack.c.bf16 %v231_v55, %v230_v54  ;;  %v318_v57 = vld [vmem:[%s697_s4] ss:$0 sm:$0xff] }
  0x1f   :  { %439 = vmatpush3.bf16.msra.mxu1 %v438_v12  ;;  %460 = vmatpush3.bf16.msra.mxu0 %v459_v33  ;;  %v319_v62 = vld [vmem:[%s699_s6] ss:$0 sm:$0xff] }
  0x20   :  { %440 = vmatprep.subr.bf16.mxu1 %v510_v1  ;;  %461 = vmatprep.subr.bf16.mxu0 %v510_v1 }
  0x23   :  { %442 = vmatpush3.bf16.msra.mxu1 %v441_v15  ;;  %463 = vmatpush3.bf16.msra.mxu0 %v462_v36 }
  0x24   :  { %443 = vmatprep.subr.bf16.mxu1 %v510_v1  ;;  %464 = vmatprep.subr.bf16.mxu0 %v510_v1 }
  0x27   :  { %445 = vmatpush3.bf16.msra.mxu1 %v444_v18  ;;  %466 = vmatpush3.bf16.msra.mxu0 %v465_v39 }
  0x28   :  { %446 = vmatprep.subr.bf16.mxu1 %v510_v1  ;;  %467 = vmatprep.subr.bf16.mxu0 %v510_v1 }
  0x2b   :  { %448 = vmatpush3.bf16.msra.mxu1 %v447_v21  ;;  %469 = vmatpush3.bf16.msra.mxu0 %v468_v42 }
  0x2c   :  { %449 = vmatprep.subr.bf16.mxu1 %v510_v1  ;;  %470 = vmatprep.subr.bf16.mxu0 %v510_v1 }
  0x2f   :  { %451 = vmatpush3.bf16.msra.mxu1 %v450_v24  ;;  %472 = vmatpush3.bf16.msra.mxu0 %v471_v45 }
  0x30   :  { %452 = vmatprep.subr.bf16.mxu1 %v510_v1  ;;  %473 = vmatprep.subr.bf16.mxu0 %v510_v1 }
  0x33   :  { %454 = vmatpush3.bf16.msra.mxu1 %v453_v27  ;;  %475 = vmatpush3.bf16.msra.mxu0 %v474_v48 }
  0x34   :  { %476 = vmatprep.subr.bf16.mxu0 %v510_v1 }
  0x37   :  { %478 = vmatpush3.bf16.msra.mxu0 %v477_v56 }
  0xe8   :  { %v117_v50 = vpop.f32.mrb[0].mxu0 }
  0xe9   :  { %v118_v51 = vadd.f32 %v316_v49, %v117_v50  ;;  %v360_v52 = vpop.f32.mrb[1].mxu0 }
  0xeb   :  { %v121_v53 = vmax.f32 %v118_v51, 0.0 }
  0xed   :  { %394 = vmatmul.mubr.f32.vlgmr.msra.gmra.mrb[0].mxu1 %v121_v53 }
 0x1c0   :  { %v211_v58 = vpop.f32.mrb[0].mxu1 }
 0x1c1   :  { %v212_v59 = vadd.f32 %v318_v57, %v211_v58  ;;  %v395_v60 = vpop.f32.mrb[1].mxu1 }
 0x1c3   :  { %v215_v61 = vmax.f32 %v212_v59, 0.0 }
 0x1c5   :  { %429 = vmatmul.mubr.f32.vlgmr.msra.gmra.mrb[2].mxu0 %v215_v61 }
 0x298   :  { %v305_v63 = vpop.f32.mrb[2].mxu0 }
 0x299   :  { %v306_v0 = vadd.f32 %v319_v62, %v305_v63  ;;  %v430_v1 = vpop.f32.mrb[3].mxu0 }
 0x29b   :  { %310 = vst.msk [vmem:[%s700_s7] sm:$0xff] %vm309_vm2, %v306_v0 }
 0x29c   :  { %315 = vsyncpa [#allocation3], 1 }

</bundles_post_ra>
